<compile_context>
chip_gen: v5e
topology: v5e:2x2
jax: 0.10.0
libtpu: 0.0.40
codegen_flags: <defaults>
</compile_context>

<pallas_src>
import jax
import jax.numpy as jnp
from jax.experimental import pallas as pl
from jax.experimental.pallas import tpu as pltpu


def nnet_kernel(params_ref, x_ref, out_ref):
    """One batch tile.

    params_ref : (16,) f32 in SMEM
                 [w1 (3x3 row-major, (out,in)) : 0..8,
                  b1 (3)                       : 9..11,
                  w2 (3)                       : 12..14,
                  b2 (1)                       : 15]
    x_ref      : (3, R_blk, 128) f32 in VMEM  -- feature, batch-rows, batch-lanes
    out_ref    : (R_blk, 128)    f32 in VMEM
    """
    x0 = x_ref[0]          # (R_blk, 128) full-vreg slabs
    x1 = x_ref[1]
    x2 = x_ref[2]

    # linear1 + relu : pure VPU broadcast-FMA with SMEM scalar weights.
    h0 = jnp.maximum(
        params_ref[0] * x0 + params_ref[1] * x1 + params_ref[2] * x2 + params_ref[9], 0.0)
    h1 = jnp.maximum(
        params_ref[3] * x0 + params_ref[4] * x1 + params_ref[5] * x2 + params_ref[10], 0.0)
    h2 = jnp.maximum(
        params_ref[6] * x0 + params_ref[7] * x1 + params_ref[8] * x2 + params_ref[11], 0.0)

    # linear2 -> dense (R_blk, 128) unmasked store.
    out_ref[...] = (params_ref[12] * h0 + params_ref[13] * h1
                    + params_ref[14] * h2 + params_ref[15])


def _cdiv(a, b):
    return -(-a // b)


def _round_up(n, m):
    return ((n + m - 1) // m) * m


def _choose_blocking(B, target_block_rows):
    """Pick (rows_pad, rows_per_block, grid_steps) for a batch of B.

    rows are 128-lane groups; block granularity is 8 rows (one f32 (8,128) tile).
    Batch is padded only to block granularity (never to a huge block multiple),
    and the grid is forced to >= 2 steps whenever the batch spans >= 2 tiles so
    the "parallel" axis can be sharded across v7x's two TensorCores.
    """
    rows = _round_up(_cdiv(max(B, 1), 128), 8)
    steps = _cdiv(rows, max(target_block_rows, 8))
    if rows >= 16:
        steps = max(steps, 2)           # megacore: keep both v7x TCs busy
    r_blk = _round_up(_cdiv(rows, steps), 8)
    rows_pad = steps * r_blk
    return rows_pad, r_blk, steps


def nnet_forward(x, w1, b1, w2, b2, *, target_block_rows=2048):
    """NNet forward.  x: (B, 3) f32.  w1: (3,3) (out,in), b1: (3,), w2: (1,3), b2: (1,).

    Returns (B, 1) f32, identical to relu(x @ w1.T + b1) @ w2.T + b2.
    """
    B = int(x.shape[0])
    x = jnp.asarray(x, jnp.float32)

    # All 16 parameters as one flat SMEM scalar table (read on the scalar path,
    # broadcast into the VPU ops) -- no transposes, no padded VMEM weight tiles.
    params = jnp.concatenate([
        jnp.asarray(w1, jnp.float32).reshape(-1),   # 9
        jnp.asarray(b1, jnp.float32).reshape(-1),   # 3
        jnp.asarray(w2, jnp.float32).reshape(-1),   # 3
        jnp.asarray(b2, jnp.float32).reshape(-1),   # 1
    ])

    rows_pad, r_blk, steps = _choose_blocking(B, target_block_rows)
    b_pad = rows_pad * 128

    # Feature-major relayout; pad only the ragged tail, then view the batch as
    # dense (rows, 128) lane-major tiles.
    xt = x.T                                        # (3, B)
    if b_pad != B:
        xt = jnp.pad(xt, ((0, 0), (0, b_pad - B)))  # ragged tail only
    xt = xt.reshape(3, rows_pad, 128)

    # Double-buffered VMEM footprint: 2 * (3 + 1) * r_blk * 128 * 4 bytes.
    blk_bytes = (3 + 1) * r_blk * 128 * 4
    vmem_limit = min(max(2 * blk_bytes + (2 << 20), 8 << 20), 64 << 20)

    out = pl.pallas_call(
        nnet_kernel,
        out_shape=jax.ShapeDtypeStruct((rows_pad, 128), jnp.float32),
        grid=(steps,),
        in_specs=[
            pl.BlockSpec(memory_space=pltpu.MemorySpace.SMEM),        # params (whole array)
            pl.BlockSpec((3, r_blk, 128), lambda i: (0, i, 0)),       # x tile
        ],
        out_specs=pl.BlockSpec((r_blk, 128), lambda i: (i, 0)),
        compiler_params=pltpu.CompilerParams(
            dimension_semantics=("parallel",),
            vmem_limit_bytes=vmem_limit,
        ),
        cost_estimate=pl.CostEstimate(
            flops=27 * b_pad, transcendentals=0, bytes_accessed=16 * b_pad),
    )(params, xt)

    # Padded tail columns compute relu(b1)@w2 + b2 (a harmless constant) and are
    # sliced off here.
    return out.reshape(-1)[:B].reshape(B, 1)


if __name__ == "__main__":
    key = jax.random.PRNGKey(0)
    B = 8
    x = jax.random.normal(key, (B, 3), dtype=jnp.float32)

    # Deterministic parameter init matching NNet._init_weights(): fill 0.1.
    w1 = jnp.full((3, 3), 0.1, dtype=jnp.float32)   # linear1.weight (out, in)
    b1 = jnp.full((3,), 0.1, dtype=jnp.float32)     # linear1.bias
    w2 = jnp.full((1, 3), 0.1, dtype=jnp.float32)   # linear2.weight (out, in)
    b2 = jnp.full((1,), 0.1, dtype=jnp.float32)     # linear2.bias

    out = jax.block_until_ready(nnet_forward(x, w1, b1, w2, b2))

    # Reference check in plain JAX (same math as the PyTorch forward).
    h_ref = jnp.maximum(x @ w1.T + b1, 0.0)
    y_ref = h_ref @ w2.T + b2
    assert out.shape == (B, 1)
    assert jnp.allclose(out, y_ref, atol=1e-5, rtol=1e-5)

    # Also exercise the multi-block (grid > 1, megacore-shardable) path with
    # ragged-tail padding.
    B2 = 2500
    x2 = jax.random.normal(jax.random.PRNGKey(1), (B2, 3), dtype=jnp.float32)
    out2 = jax.block_until_ready(
        nnet_forward(x2, w1, b1, w2, b2, target_block_rows=8))
    y2_ref = jnp.maximum(x2 @ w1.T + b1, 0.0) @ w2.T + b2
    assert out2.shape == (B2, 1)
    assert jnp.allclose(out2, y2_ref, atol=1e-5, rtol=1e-5)

    print("KERNEL_OK")
</pallas_src>

<mosaic_0001>
module attributes {stable_mosaic.version = 11 : i64} {
  func.func @nnet_kernel(%arg0: i32, %arg1: memref<16xf32, #tpu.memory_space<smem>>, %arg2: memref<3x8x128xf32, #tpu.memory_space<vmem>>, %arg3: memref<8x128xf32, #tpu.memory_space<vmem>>) attributes {dimension_semantics = [#tpu.dimension_semantics<parallel>], iteration_bounds = array<i64: 1>, scalar_prefetch = 0 : i64, scratch_operands = 0 : i64, tpu.core_type = #tpu.core_type<tc>, window_params = [{transform_indices = @transform_0, window_bounds = array<i64: 16>}, {transform_indices = @transform_1, window_bounds = array<i64: 3, 8, 128>}, {transform_indices = @transform_2, window_bounds = array<i64: 8, 128>}]} {
    %c0 = arith.constant 0 : index
    %c0_0 = arith.constant 0 : index
    %c0_1 = arith.constant 0 : index
    %0 = vector.load %arg2[%c0, %c0_0, %c0_1] : memref<3x8x128xf32, #tpu.memory_space<vmem>>, vector<1x8x128xf32>
    %1 = vector.shape_cast %0 : vector<1x8x128xf32> to vector<8x128xf32>
    %c1 = arith.constant 1 : index
    %c0_2 = arith.constant 0 : index
    %c0_3 = arith.constant 0 : index
    %2 = vector.load %arg2[%c1, %c0_2, %c0_3] : memref<3x8x128xf32, #tpu.memory_space<vmem>>, vector<1x8x128xf32>
    %3 = vector.shape_cast %2 : vector<1x8x128xf32> to vector<8x128xf32>
    %c2 = arith.constant 2 : index
    %c0_4 = arith.constant 0 : index
    %c0_5 = arith.constant 0 : index
    %4 = vector.load %arg2[%c2, %c0_4, %c0_5] : memref<3x8x128xf32, #tpu.memory_space<vmem>>, vector<1x8x128xf32>
    %5 = vector.shape_cast %4 : vector<1x8x128xf32> to vector<8x128xf32>
    %c0_6 = arith.constant 0 : index
    %6 = memref.load %arg1[%c0_6] : memref<16xf32, #tpu.memory_space<smem>>
    %7 = vector.broadcast %6 : f32 to vector<8x128xf32>
    %8 = arith.mulf %7, %1 : vector<8x128xf32>
    %c1_7 = arith.constant 1 : index
    %9 = memref.load %arg1[%c1_7] : memref<16xf32, #tpu.memory_space<smem>>
    %10 = vector.broadcast %9 : f32 to vector<8x128xf32>
    %11 = arith.mulf %10, %3 : vector<8x128xf32>
    %12 = arith.addf %8, %11 : vector<8x128xf32>
    %c2_8 = arith.constant 2 : index
    %13 = memref.load %arg1[%c2_8] : memref<16xf32, #tpu.memory_space<smem>>
    %14 = vector.broadcast %13 : f32 to vector<8x128xf32>
    %15 = arith.mulf %14, %5 : vector<8x128xf32>
    %16 = arith.addf %12, %15 : vector<8x128xf32>
    %c9 = arith.constant 9 : index
    %17 = memref.load %arg1[%c9] : memref<16xf32, #tpu.memory_space<smem>>
    %18 = vector.broadcast %17 : f32 to vector<8x128xf32>
    %19 = arith.addf %16, %18 : vector<8x128xf32>
    %cst = arith.constant 0.000000e+00 : f32
    %20 = vector.broadcast %cst : f32 to vector<8x128xf32>
    %21 = arith.maximumf %19, %20 : vector<8x128xf32>
    %c3 = arith.constant 3 : index
    %22 = memref.load %arg1[%c3] : memref<16xf32, #tpu.memory_space<smem>>
    %23 = vector.broadcast %22 : f32 to vector<8x128xf32>
    %24 = arith.mulf %23, %1 : vector<8x128xf32>
    %c4 = arith.constant 4 : index
    %25 = memref.load %arg1[%c4] : memref<16xf32, #tpu.memory_space<smem>>
    %26 = vector.broadcast %25 : f32 to vector<8x128xf32>
    %27 = arith.mulf %26, %3 : vector<8x128xf32>
    %28 = arith.addf %24, %27 : vector<8x128xf32>
    %c5 = arith.constant 5 : index
    %29 = memref.load %arg1[%c5] : memref<16xf32, #tpu.memory_space<smem>>
    %30 = vector.broadcast %29 : f32 to vector<8x128xf32>
    %31 = arith.mulf %30, %5 : vector<8x128xf32>
    %32 = arith.addf %28, %31 : vector<8x128xf32>
    %c10 = arith.constant 10 : index
    %33 = memref.load %arg1[%c10] : memref<16xf32, #tpu.memory_space<smem>>
    %34 = vector.broadcast %33 : f32 to vector<8x128xf32>
    %35 = arith.addf %32, %34 : vector<8x128xf32>
    %cst_9 = arith.constant 0.000000e+00 : f32
    %36 = vector.broadcast %cst_9 : f32 to vector<8x128xf32>
    %37 = arith.maximumf %35, %36 : vector<8x128xf32>
    %c6 = arith.constant 6 : index
    %38 = memref.load %arg1[%c6] : memref<16xf32, #tpu.memory_space<smem>>
    %39 = vector.broadcast %38 : f32 to vector<8x128xf32>
    %40 = arith.mulf %39, %1 : vector<8x128xf32>
    %c7 = arith.constant 7 : index
    %41 = memref.load %arg1[%c7] : memref<16xf32, #tpu.memory_space<smem>>
    %42 = vector.broadcast %41 : f32 to vector<8x128xf32>
    %43 = arith.mulf %42, %3 : vector<8x128xf32>
    %44 = arith.addf %40, %43 : vector<8x128xf32>
    %c8 = arith.constant 8 : index
    %45 = memref.load %arg1[%c8] : memref<16xf32, #tpu.memory_space<smem>>
    %46 = vector.broadcast %45 : f32 to vector<8x128xf32>
    %47 = arith.mulf %46, %5 : vector<8x128xf32>
    %48 = arith.addf %44, %47 : vector<8x128xf32>
    %c11 = arith.constant 11 : index
    %49 = memref.load %arg1[%c11] : memref<16xf32, #tpu.memory_space<smem>>
    %50 = vector.broadcast %49 : f32 to vector<8x128xf32>
    %51 = arith.addf %48, %50 : vector<8x128xf32>
    %cst_10 = arith.constant 0.000000e+00 : f32
    %52 = vector.broadcast %cst_10 : f32 to vector<8x128xf32>
    %53 = arith.maximumf %51, %52 : vector<8x128xf32>
    %c12 = arith.constant 12 : index
    %54 = memref.load %arg1[%c12] : memref<16xf32, #tpu.memory_space<smem>>
    %55 = vector.broadcast %54 : f32 to vector<8x128xf32>
    %56 = arith.mulf %55, %21 : vector<8x128xf32>
    %c13 = arith.constant 13 : index
    %57 = memref.load %arg1[%c13] : memref<16xf32, #tpu.memory_space<smem>>
    %58 = vector.broadcast %57 : f32 to vector<8x128xf32>
    %59 = arith.mulf %58, %37 : vector<8x128xf32>
    %60 = arith.addf %56, %59 : vector<8x128xf32>
    %c14 = arith.constant 14 : index
    %61 = memref.load %arg1[%c14] : memref<16xf32, #tpu.memory_space<smem>>
    %62 = vector.broadcast %61 : f32 to vector<8x128xf32>
    %63 = arith.mulf %62, %53 : vector<8x128xf32>
    %64 = arith.addf %60, %63 : vector<8x128xf32>
    %c15 = arith.constant 15 : index
    %65 = memref.load %arg1[%c15] : memref<16xf32, #tpu.memory_space<smem>>
    %66 = vector.broadcast %65 : f32 to vector<8x128xf32>
    %67 = arith.addf %64, %66 : vector<8x128xf32>
    %c0_11 = arith.constant 0 : index
    %c0_12 = arith.constant 0 : index
    %68 = vector.load %arg3[%c0_11, %c0_12] : memref<8x128xf32, #tpu.memory_space<vmem>>, vector<8x128xf32>
    tpu.vector_store %arg3[%c0_11, %c0_12], %67 {strides = array<i32>} : memref<8x128xf32, #tpu.memory_space<vmem>>, vector<8x128xf32>,
    return
  }
  func.func @transform_0(%arg0: i32) -> i32 {
    %c0_i32 = arith.constant 0 : i32
    %c0_i32_0 = arith.constant 0 : i32
    return %c0_i32 : i32
  }
  func.func @transform_1(%arg0: i32) -> (i32, i32, i32) {
    %c0_i32 = arith.constant 0 : i32
    %c0_i32_0 = arith.constant 0 : i32
    %c0_i32_1 = arith.constant 0 : i32
    return %c0_i32, %arg0, %c0_i32_0 : i32, i32, i32
  }
  func.func @transform_2(%arg0: i32) -> (i32, i32) {
    %c0_i32 = arith.constant 0 : i32
    %c0_i32_0 = arith.constant 0 : i32
    return %arg0, %c0_i32 : i32, i32
  }
}

</mosaic_0001>

<bundles_post_ra>
// kernel: tpu_custom_call.1
= control target key start
LH: loop header
LB: loop body
LE: loop exit
PB: predicated region body
PF: predicated region fallthrough
CT: control target
= control target key end

     0   :  { %7 = vsyncpa [#allocation5], 0  ;;  %s242_s0 = inlined_call_operand.hbm [shape: f32[16], index: 0, kind: input, shape index: {}]   ;;  %s243_s1 = inlined_call_operand.hbm [shape: f32[3,8,128], index: 1, kind: input, shape index: {}]   ;;  %s244_s2 = inlined_call_operand.hbm [shape: f32[8,128], index: 2, kind: output, shape index: {}]  }
   0x1   :  { %8 = vsyncpa [#allocation3], 0 }
   0x2   :  { %9 = vsyncpa [#allocation4], 0  ;;  %s15_s11 = sshll.u32 %s242_s0, 4  ;;  %s23_s14 = sshll.u32 %s243_s1, 4  ;;  %s16_s11 = int_to_ptr.hbm [resolvable:$true] %s15_s11  ;;  %s24_s14 = int_to_ptr.hbm [resolvable:$true] %s23_s14 }
   0x3   :  { %s210_s15 = smov [#allocation2]   ;;  %s211_s16 = smov [#allocation6]  }
   0x4   :  { %18 = dma.hbm_to_smem %s16_s11, 16, %s210_s15, [#allocation5]  }
   0x5   :  { %s25_s17 = sshll.u32 %s211_s16, 4  ;;  %s212_s18 = smov 128   ;;  %s26_s17 = int_to_ptr.vmem [resolvable:$true] %s25_s17 }
   0x6   :  { %s213_s19 = smov 8  }
   0x7   :  { %31 = dma.hbm_to_vmem [thread:$0]  %s24_s14, 384, %s26_s17, [#allocation3], %s212_s18, %s212_s18, %s213_s19  }
   0x8   :  { %204 = dma.done.wait [#allocation5], 16  }
   0x9   :  { %205 = vsyncadd [#allocation5], 4294967280 }
   0xa   :  { %206 = dma.done.wait [#allocation3], 384  }
   0xb   :  { %207 = vsyncadd [#allocation3], 4294966912 }
   0xc   :  { %40 = sfence }
   0xd   :  { %s46_s0 = sld [smem:[#allocation2]]  ;;  %v41_v0 = vld [vmem:[#allocation6] sm:$0xff]  ;;  %v43_v1 = vld [vmem:[#allocation6 + $0x8] sm:$0xff]  ;;  %v45_v2 = vld [vmem:[#allocation6 + $0x10] sm:$0xff]  ;;  %s214_s6 = smov [#allocation7]  }
   0xe   :  { %s124_s20 = sld [smem:[#allocation2 + $0x1]]  ;;  %s111_s7 = sshll.u32 %s214_s6, 4  ;;  %s112_s7 = int_to_ptr.vmem [resolvable:$true] %s111_s7 }
   0xf   :  { %s125_s21 = sld [smem:[#allocation2 + $0x2]]  ;;  %s113_s10 = sshll.u32 %s244_s2, 4  ;;  %s114_s10 = int_to_ptr.hbm [resolvable:$true] %s113_s10 }
  0x10   :  { %s126_s22 = sld [smem:[#allocation2 + $0x9]] }
  0x11   :  { %s127_s1 = sld [smem:[#allocation2 + $0x3]] }
  0x12   :  { %s128_s23 = sld [smem:[#allocation2 + $0x4]] }
  0x13   :  { %v47_v3 = vstv %s46_s0  ;;  %s129_s24 = sld [smem:[#allocation2 + $0x5]] }
  0x14   :  { %v48_v4 = vmul.f32 %v47_v3, %v41_v0  ;;  %v50_v5 = vstv %s124_s20  ;;  %s236_s25 = sld [smem:[#allocation2 + $0xa]] }
  0x15   :  { %v51_v6 = vmul.f32 %v50_v5, %v43_v1  ;;  %v54_v7 = vstv %s125_s21  ;;  %s131_s26 = sld [smem:[#allocation2 + $0x6]] }
  0x16   :  { %v55_v8 = vmul.f32 %v54_v7, %v45_v2  ;;  %s132_s27 = sld [smem:[#allocation2 + $0x7]]  ;;  %v58_v11 = vstv %s126_s22 }
  0x17   :  { %v52_v9 = vadd.f32 %v51_v6, %v48_v4  ;;  %v62_v10 = vstv %s127_s1  ;;  %s133_s28 = sld [smem:[#allocation2 + $0x8]] }
  0x18   :  { %v63_v12 = vmul.f32 %v62_v10, %v41_v0  ;;  %v65_v13 = vstv %s128_s23  ;;  %s134_s29 = sld [smem:[#allocation2 + $0xb]] }
  0x19   :  { %v56_v14 = vadd.f32 %v55_v8, %v52_v9  ;;  %v66_v15 = vmul.f32 %v65_v13, %v43_v1  ;;  %v69_v16 = vstv %s129_s24  ;;  %s135_s30 = sld [smem:[#allocation2 + $0xc]] }
  0x1a   :  { %v70_v17 = vmul.f32 %v69_v16, %v45_v2  ;;  %s136_s3 = sld [smem:[#allocation2 + $0xd]]  ;;  %v73_v21 = vstv %s236_s25 }
  0x1b   :  { %v59_v18 = vadd.f32 %v58_v11, %v56_v14  ;;  %v67_v19 = vadd.f32 %v66_v15, %v63_v12  ;;  %v77_v20 = vstv %s131_s26  ;;  %s137_s4 = sld [smem:[#allocation2 + $0xe]] }
  0x1c   :  { %v78_v22 = vmul.f32 %v77_v20, %v41_v0  ;;  %v80_v23 = vstv %s132_s27  ;;  %s138_s5 = sld [smem:[#allocation2 + $0xf]] }
  0x1d   :  { %v60_v24 = vmax.f32 %v59_v18, 0.0  ;;  %v71_v25 = vadd.f32 %v70_v17, %v67_v19  ;;  %v81_v26 = vmul.f32 %v80_v23, %v43_v1  ;;  %v84_v27 = vstv %s133_s28 }
  0x1e   :  { %v85_v28 = vmul.f32 %v84_v27, %v45_v2  ;;  %v88_v32 = vstv %s134_s29 }
  0x1f   :  { %v74_v29 = vadd.f32 %v73_v21, %v71_v25  ;;  %v82_v30 = vadd.f32 %v81_v26, %v78_v22  ;;  %v92_v31 = vstv %s135_s30 }
  0x20   :  { %v95_v33 = vstv %s136_s3  ;;  %v93_v36 = vmul.f32 %v92_v31, %v60_v24 }
  0x21   :  { %v75_v34 = vmax.f32 %v74_v29, 0.0  ;;  %v86_v35 = vadd.f32 %v85_v28, %v82_v30  ;;  %v99_v39 = vstv %s137_s4 }
  0x22   :  { %v103_v43 = vstv %s138_s5 }
  0x23   :  { %v89_v37 = vadd.f32 %v88_v32, %v86_v35  ;;  %v96_v38 = vmul.f32 %v95_v33, %v75_v34 }
  0x25   :  { %v90_v40 = vmax.f32 %v89_v37, 0.0  ;;  %v97_v41 = vadd.f32 %v96_v38, %v93_v36 }
  0x27   :  { %v100_v42 = vmul.f32 %v99_v39, %v90_v40 }
  0x29   :  { %v101_v44 = vadd.f32 %v100_v42, %v97_v41 }
  0x2b   :  { %v104_v45 = vadd.f32 %v103_v43, %v101_v44 }
  0x2d   :  { %105 = vst [vmem:[#allocation7] sm:$0xff] %v104_v45 }
  0x2e   :  { %116 = dma.vmem_to_hbm [thread:$0]  %s112_s7, 128, %s114_s10, [#allocation4]  }
  0x2f   :  { %208 = dma.done.wait [#allocation4], 128  }
  0x30   :  { %209 = vsyncadd [#allocation4], 4294967168 }
  0x31   :  { %121 = vsyncpa [#allocation3], 1 }
  0x32   :  { %122 = vsyncpa [#allocation4], 1 }
  0x33   :  { %123 = vsyncpa [#allocation5], 1 }

</bundles_post_ra>
